<compile_context>
chip_gen: v7x
topology: tpu7x:2x2x1
jax: 0.10.0
libtpu: 0.0.40
codegen_flags: <defaults>
</compile_context>

<pallas_src>
import functools

import jax
import jax.numpy as jnp
from jax.experimental import pallas as pl
from jax.experimental.pallas import tpu as pltpu


# ----------------------- fused GCN + readout + head kernel ------------------

def gcn_net_kernel(a_ref, x_ref, w1x_ref, b1_ref, w2h_ref, b2_ref,
                   sel_from_ref, sel_to_ref, wfa_ref, wfb_ref, bfc_ref,
                   out_ref):
    """One grid step = a block of G graphs (G/2 complete (g1, g2) pairs)."""
    H = w2h_ref.shape[0]

    a = a_ref[0]                                   # (GN, GN) bf16 block-diagonal Ahat
    x = x_ref[0]                                   # (GN, F)  bf16

    # Aggregation 1: Ahat @ X for all G graphs in one block-diagonal matmul.
    ax = jnp.dot(a, x, preferred_element_type=jnp.float32)           # (GN, F) f32
    ax_bf = ax.astype(jnp.bfloat16)                                   # cast once

    # Fused [W1 | W2_x]: single (GN,F)@(F,H+O) push, lane width H+O=128.
    pre = jnp.dot(ax_bf, w1x_ref[...], preferred_element_type=jnp.float32)

    # H1 = relu((A X) W1 + b1)
    h1 = jnp.maximum(pre[:, :H] + b1_ref[...], 0.0)                   # (GN, H) f32
    h1_bf = h1.astype(jnp.bfloat16)

    # Aggregation 2: Ahat @ H1 (block-diagonal matmul).
    ah1 = jnp.dot(a, h1_bf, preferred_element_type=jnp.float32)       # (GN, H) f32

    # H2 = relu(A [H1, X] W2 + b2) == relu((A H1) W2_h + (A X) W2_x + b2)
    h2 = jnp.maximum(
        jnp.dot(ah1.astype(jnp.bfloat16), w2h_ref[...],
                preferred_element_type=jnp.float32)
        + pre[:, H:] + b2_ref[...],
        0.0)                                                          # (GN, O) f32

    # mean_nodes(concat(H1, H2)) via precomputed 1/N selectors (rides the MXU):
    # one dot per pair-half against the lane-concatenated [H1 | H2] (128 wide).
    h_cat = jnp.concatenate([h1_bf, h2.astype(jnp.bfloat16)], axis=-1)   # (GN, H+O)
    r_from = jnp.dot(sel_from_ref[...], h_cat,
                     preferred_element_type=jnp.float32)              # (P, H+O) f32
    r_to = jnp.dot(sel_to_ref[...], h_cat,
                   preferred_element_type=jnp.float32)                # (P, H+O) f32

    # fc(concat(From_x, To_x)) + log_softmax over the 2 classes (stable logaddexp,
    # no cross-lane reductions). Head stays in f32 (tiny).
    logits = (jnp.dot(r_from, wfa_ref[...], preferred_element_type=jnp.float32)
              + jnp.dot(r_to, wfb_ref[...], preferred_element_type=jnp.float32)
              + bfc_ref[...])                                         # (P, 2)
    z0 = logits[:, 0:1]
    z1 = logits[:, 1:2]
    m = jnp.maximum(z0, z1)
    lse = m + jnp.log(jnp.exp(z0 - m) + jnp.exp(z1 - m))
    out_ref[0] = logits - lse


# --------------------------------- wrapper ----------------------------------

def prepare_params(params):
    """One-time (init-time) weight casting / splitting / fusion. Call once."""
    H = params["w1"].shape[1]
    O = params["w2"].shape[1]
    w2h = params["w2"][:H]                      # rows of W2 acting on H1
    w2x = params["w2"][H:]                      # rows of W2 acting on X
    return dict(
        # Fused [W1 | W2_x] -> one (F, H+O) bf16 weight.
        w1x=jnp.concatenate([params["w1"], w2x], axis=1).astype(jnp.bfloat16),
        b1=params["b1"].astype(jnp.float32),
        w2h=w2h.astype(jnp.bfloat16),
        b2=params["b2"].astype(jnp.float32),
        # fc weight split into the From_x / To_x halves (feat = [From_x | To_x]).
        wfc_a=params["wfc_t"][:H + O].astype(jnp.float32),
        wfc_b=params["wfc_t"][H + O:].astype(jnp.float32),
        bfc=params["bfc"].astype(jnp.float32),
    )


def _choose_graphs_per_block(n_graphs, n_nodes, target_rows=256):
    """Largest even divisor of n_graphs with G*N <= target_rows (MXU-tile sizing)."""
    best = 2
    for g in range(2, n_graphs + 1, 2):
        if n_graphs % g == 0 and g * n_nodes <= target_rows:
            best = g
    return best


@functools.partial(jax.jit, static_argnames=("graphs_per_block",))
def net_forward(a1, x1, a2, x2, prep, graphs_per_block=None):
    """Full Net forward (dual-graph branch). a*: (B,N,N) Ahat, x*: (B,N,F)."""
    B, N, F = x1.shape
    H, O = prep["w2h"].shape
    n_graphs = 2 * B
    G = graphs_per_block or _choose_graphs_per_block(n_graphs, N)
    assert G % 2 == 0 and n_graphs % G == 0, "graphs_per_block must be even and divide 2*B"
    nb = n_graphs // G
    GN = G * N
    P = G // 2

    # Pair-interleave g1/g2 so each block of G graphs holds P complete pairs.
    a = jnp.stack([a1, a2], axis=1).reshape(n_graphs, N, N).astype(jnp.bfloat16)
    x = jnp.stack([x1, x2], axis=1).reshape(nb, GN, F).astype(jnp.bfloat16)

    # Block-diagonal adjacency per grid block: (nb, GN, GN) bf16.
    eye = jnp.eye(G, dtype=jnp.bfloat16)
    a_bd = (a.reshape(nb, G, N, 1, N) * eye[None, :, None, :, None]).reshape(nb, GN, GN)

    # mean_nodes selectors (grid-invariant, resident): From / To graph of each pair.
    cols = jnp.arange(GN)[None, :] // N          # graph index of each node column
    rows = jnp.arange(P)[:, None]
    sel_from = jnp.where(cols == 2 * rows, 1.0 / N, 0.0).astype(jnp.bfloat16)   # (P, GN)
    sel_to = jnp.where(cols == 2 * rows + 1, 1.0 / N, 0.0).astype(jnp.bfloat16)  # (P, GN)

    out = pl.pallas_call(
        gcn_net_kernel,
        out_shape=jax.ShapeDtypeStruct((nb, P, 2), jnp.float32),
        grid_spec=pltpu.PrefetchScalarGridSpec(
            num_scalar_prefetch=0,
            grid=(nb,),
            in_specs=[
                pl.BlockSpec((1, GN, GN), lambda i: (i, 0, 0)),   # block-diag Ahat
                pl.BlockSpec((1, GN, F), lambda i: (i, 0, 0)),    # X block
                pl.BlockSpec((F, H + O), lambda i: (0, 0)),       # [W1 | W2_x] resident
                pl.BlockSpec((1, H), lambda i: (0, 0)),           # b1
                pl.BlockSpec((H, O), lambda i: (0, 0)),           # W2_h
                pl.BlockSpec((1, O), lambda i: (0, 0)),           # b2
                pl.BlockSpec((P, GN), lambda i: (0, 0)),          # mean selector (From)
                pl.BlockSpec((P, GN), lambda i: (0, 0)),          # mean selector (To)
                pl.BlockSpec((H + O, 2), lambda i: (0, 0)),       # fc weight (From half)
                pl.BlockSpec((H + O, 2), lambda i: (0, 0)),       # fc weight (To half)
                pl.BlockSpec((1, 2), lambda i: (0, 0)),           # fc bias
            ],
            out_specs=pl.BlockSpec((1, P, 2), lambda i: (i, 0, 0)),
        ),
        compiler_params=pltpu.CompilerParams(
            dimension_semantics=("parallel",),   # blocks shard across TCs on v7x
        ),
    )(a_bd, x, prep["w1x"], prep["b1"], prep["w2h"], prep["b2"],
      sel_from, sel_to, prep["wfc_a"], prep["wfc_b"], prep["bfc"])

    return out.reshape(B, 2)


# ----------------------- plain-JAX glue / reference -------------------------

def normalized_adjacency(key, B, N):
    """Random symmetric graph + self loops, normalized Ahat = D^-1/2 A D^-1/2."""
    a = (jax.random.uniform(key, (B, N, N)) > 0.5).astype(jnp.float32)
    a = jnp.maximum(a, jnp.transpose(a, (0, 2, 1)))
    a = jnp.maximum(a, jnp.eye(N, dtype=jnp.float32)[None])       # avoid zero degree
    deg = jnp.sum(a, axis=-1)
    dinv = 1.0 / jnp.sqrt(deg)
    return a * dinv[:, :, None] * dinv[:, None, :]


def init_params(key, nfeat, nhid, nout):
    ks = jax.random.split(key, 6)
    s = 0.1
    return dict(
        w1=s * jax.random.normal(ks[0], (nfeat, nhid), jnp.float32),
        b1=s * jax.random.normal(ks[1], (1, nhid), jnp.float32),
        w2=s * jax.random.normal(ks[2], (nhid + nfeat, nout), jnp.float32),
        b2=s * jax.random.normal(ks[3], (1, nout), jnp.float32),
        # nn.Linear((nhid+nout)*2, 2): weight stored transposed -> x @ W^T
        wfc_t=s * jax.random.normal(ks[4], ((nhid + nout) * 2, 2), jnp.float32),
        bfc=s * jax.random.normal(ks[5], (1, 2), jnp.float32),
    )


def net_reference(a1, x1, a2, x2, params):
    """Pure-JAX f32 reference for the dual-graph branch of Net.forward."""
    def from_to_gcn(a, x):
        h1 = jax.nn.relu(
            jnp.einsum("gnm,gmf->gnf", a, x) @ params["w1"] + params["b1"])
        cat = jnp.concatenate([h1, x], axis=-1)
        h2 = jax.nn.relu(
            jnp.einsum("gnm,gmf->gnf", a, cat) @ params["w2"] + params["b2"])
        return jnp.mean(jnp.concatenate([h1, h2], axis=-1), axis=1)
    feat = jnp.concatenate([from_to_gcn(a1, x1), from_to_gcn(a2, x2)], axis=-1)
    logits = feat @ params["wfc_t"] + params["bfc"]
    return jax.nn.log_softmax(logits, axis=1)


if __name__ == "__main__":
    key = jax.random.PRNGKey(0)
    # Two graph-pairs, 16 nodes each; hidden sizes chosen lane-dense (H+O = 128).
    B, N, nfeat, nhid, nout = 2, 16, 8, 64, 64

    k = jax.random.split(key, 5)
    a1 = normalized_adjacency(k[0], B, N)
    a2 = normalized_adjacency(k[1], B, N)
    x1 = jax.random.normal(k[2], (B, N, nfeat), jnp.float32)
    x2 = jax.random.normal(k[3], (B, N, nfeat), jnp.float32)
    params = init_params(k[4], nfeat, nhid, nout)
    prep = prepare_params(params)   # one-time weight prep (not per forward)

    out = jax.block_until_ready(net_forward(a1, x1, a2, x2, prep))
    ref = net_reference(a1, x1, a2, x2, params)

    assert out.shape == (B, 2)
    assert bool(jnp.all(jnp.isfinite(out)))
    # log_softmax rows should exponentiate-sum to 1
    assert bool(jnp.allclose(jnp.sum(jnp.exp(out), axis=1), 1.0, atol=1e-5))
    # bf16 inputs / f32 accumulation vs f32 reference: loose tolerance
    assert bool(jnp.allclose(out, ref, atol=1e-1, rtol=1e-1))
    print("KERNEL_OK")
</pallas_src>

<mosaic_0001>
module attributes {stable_mosaic.version = 11 : i64} {
  func.func @gcn_net_kernel(%arg0: i32, %arg1: memref<1x64x64xbf16, #tpu.memory_space<vmem>>, %arg2: memref<1x64x8xbf16, #tpu.memory_space<vmem>>, %arg3: memref<8x128xbf16, #tpu.memory_space<vmem>>, %arg4: memref<1x64xf32, #tpu.memory_space<vmem>>, %arg5: memref<64x64xbf16, #tpu.memory_space<vmem>>, %arg6: memref<1x64xf32, #tpu.memory_space<vmem>>, %arg7: memref<2x64xbf16, #tpu.memory_space<vmem>>, %arg8: memref<2x64xbf16, #tpu.memory_space<vmem>>, %arg9: memref<128x2xf32, #tpu.memory_space<vmem>>, %arg10: memref<128x2xf32, #tpu.memory_space<vmem>>, %arg11: memref<1x2xf32, #tpu.memory_space<vmem>>, %arg12: memref<1x2x2xf32, #tpu.memory_space<vmem>>) attributes {dimension_semantics = [#tpu.dimension_semantics<parallel>], iteration_bounds = array<i64: 1>, scalar_prefetch = 0 : i64, scratch_operands = 0 : i64, tpu.core_type = #tpu.core_type<tc>, window_params = [{transform_indices = @transform_0, window_bounds = array<i64: 1, 64, 64>}, {transform_indices = @transform_1, window_bounds = array<i64: 1, 64, 8>}, {pipeline_mode = #tpu.pipeline_mode<synchronous>, transform_indices = @transform_2, window_bounds = array<i64: 8, 128>}, {pipeline_mode = #tpu.pipeline_mode<synchronous>, transform_indices = @transform_3, window_bounds = array<i64: 1, 64>}, {pipeline_mode = #tpu.pipeline_mode<synchronous>, transform_indices = @transform_4, window_bounds = array<i64: 64, 64>}, {pipeline_mode = #tpu.pipeline_mode<synchronous>, transform_indices = @transform_5, window_bounds = array<i64: 1, 64>}, {pipeline_mode = #tpu.pipeline_mode<synchronous>, transform_indices = @transform_6, window_bounds = array<i64: 2, 64>}, {pipeline_mode = #tpu.pipeline_mode<synchronous>, transform_indices = @transform_7, window_bounds = array<i64: 2, 64>}, {pipeline_mode = #tpu.pipeline_mode<synchronous>, transform_indices = @transform_8, window_bounds = array<i64: 128, 2>}, {pipeline_mode = #tpu.pipeline_mode<synchronous>, transform_indices = @transform_9, window_bounds = array<i64: 128, 2>}, {pipeline_mode = #tpu.pipeline_mode<synchronous>, transform_indices = @transform_10, window_bounds = array<i64: 1, 2>}, {transform_indices = @transform_11, window_bounds = array<i64: 1, 2, 2>}]} {
    %c0 = arith.constant 0 : index
    %c0_0 = arith.constant 0 : index
    %c0_1 = arith.constant 0 : index
    %0 = vector.load %arg1[%c0, %c0_0, %c0_1] : memref<1x64x64xbf16, #tpu.memory_space<vmem>>, vector<1x64x64xbf16>
    %1 = vector.shape_cast %0 : vector<1x64x64xbf16> to vector<64x64xbf16>
    %c0_2 = arith.constant 0 : index
    %c0_3 = arith.constant 0 : index
    %c0_4 = arith.constant 0 : index
    %2 = vector.load %arg2[%c0_2, %c0_3, %c0_4] : memref<1x64x8xbf16, #tpu.memory_space<vmem>>, vector<1x64x8xbf16>
    %3 = vector.shape_cast %2 : vector<1x64x8xbf16> to vector<64x8xbf16>
    %cst = arith.constant dense<0.000000e+00> : vector<64x8xf32>
    %4 = tpu.matmul %1, %3, %cst {dimension_numbers = #tpu.dot_dimension_numbers<[1], [0], [0], [1], [0, 0, 1, 1], [], []>} : vector<64x64xbf16>, vector<64x8xbf16>, vector<64x8xf32> -> vector<64x8xf32>
    %5 = arith.truncf %4 : vector<64x8xf32> to vector<64x8xbf16>
    %c0_5 = arith.constant 0 : index
    %c0_6 = arith.constant 0 : index
    %6 = vector.load %arg3[%c0_5, %c0_6] : memref<8x128xbf16, #tpu.memory_space<vmem>>, vector<8x128xbf16>
    %cst_7 = arith.constant dense<0.000000e+00> : vector<64x128xf32>
    %7 = tpu.matmul %5, %6, %cst_7 {dimension_numbers = #tpu.dot_dimension_numbers<[1], [0], [0], [1], [0, 0, 1, 1], [], []>} : vector<64x8xbf16>, vector<8x128xbf16>, vector<64x128xf32> -> vector<64x128xf32>
    %8 = vector.extract_strided_slice %7 {offsets = [0, 0], sizes = [64, 64], strides = [1, 1]} : vector<64x128xf32> to vector<64x64xf32>
    %c0_8 = arith.constant 0 : index
    %c0_9 = arith.constant 0 : index
    %9 = vector.load %arg4[%c0_8, %c0_9] : memref<1x64xf32, #tpu.memory_space<vmem>>, vector<1x64xf32>
    %10 = vector.broadcast %9 : vector<1x64xf32> to vector<64x64xf32>
    %11 = arith.addf %8, %10 : vector<64x64xf32>
    %cst_10 = arith.constant 0.000000e+00 : f32
    %12 = vector.broadcast %cst_10 : f32 to vector<64x64xf32>
    %13 = arith.maximumf %11, %12 : vector<64x64xf32>
    %14 = arith.truncf %13 : vector<64x64xf32> to vector<64x64xbf16>
    %cst_11 = arith.constant dense<0.000000e+00> : vector<64x64xf32>
    %15 = tpu.matmul %1, %14, %cst_11 {dimension_numbers = #tpu.dot_dimension_numbers<[1], [0], [0], [1], [0, 0, 1, 1], [], []>} : vector<64x64xbf16>, vector<64x64xbf16>, vector<64x64xf32> -> vector<64x64xf32>
    %16 = arith.truncf %15 : vector<64x64xf32> to vector<64x64xbf16>
    %c0_12 = arith.constant 0 : index
    %c0_13 = arith.constant 0 : index
    %17 = vector.load %arg5[%c0_12, %c0_13] : memref<64x64xbf16, #tpu.memory_space<vmem>>, vector<64x64xbf16>
    %cst_14 = arith.constant dense<0.000000e+00> : vector<64x64xf32>
    %18 = tpu.matmul %16, %17, %cst_14 {dimension_numbers = #tpu.dot_dimension_numbers<[1], [0], [0], [1], [0, 0, 1, 1], [], []>} : vector<64x64xbf16>, vector<64x64xbf16>, vector<64x64xf32> -> vector<64x64xf32>
    %19 = vector.extract_strided_slice %7 {offsets = [0, 64], sizes = [64, 64], strides = [1, 1]} : vector<64x128xf32> to vector<64x64xf32>
    %20 = arith.addf %18, %19 : vector<64x64xf32>
    %c0_15 = arith.constant 0 : index
    %c0_16 = arith.constant 0 : index
    %21 = vector.load %arg6[%c0_15, %c0_16] : memref<1x64xf32, #tpu.memory_space<vmem>>, vector<1x64xf32>
    %22 = vector.broadcast %21 : vector<1x64xf32> to vector<64x64xf32>
    %23 = arith.addf %20, %22 : vector<64x64xf32>
    %cst_17 = arith.constant 0.000000e+00 : f32
    %24 = vector.broadcast %cst_17 : f32 to vector<64x64xf32>
    %25 = arith.maximumf %23, %24 : vector<64x64xf32>
    %26 = arith.truncf %25 : vector<64x64xf32> to vector<64x64xbf16>
    %27 = tpu.concatenate %14, %26 in 1 : vector<64x64xbf16>, vector<64x64xbf16> -> vector<64x128xbf16>
    %c0_18 = arith.constant 0 : index
    %c0_19 = arith.constant 0 : index
    %28 = vector.load %arg7[%c0_18, %c0_19] : memref<2x64xbf16, #tpu.memory_space<vmem>>, vector<2x64xbf16>
    %cst_20 = arith.constant dense<0.000000e+00> : vector<2x128xf32>
    %29 = tpu.matmul %28, %27, %cst_20 {dimension_numbers = #tpu.dot_dimension_numbers<[1], [0], [0], [1], [0, 0, 1, 1], [], []>} : vector<2x64xbf16>, vector<64x128xbf16>, vector<2x128xf32> -> vector<2x128xf32>
    %c0_21 = arith.constant 0 : index
    %c0_22 = arith.constant 0 : index
    %30 = vector.load %arg8[%c0_21, %c0_22] : memref<2x64xbf16, #tpu.memory_space<vmem>>, vector<2x64xbf16>
    %cst_23 = arith.constant dense<0.000000e+00> : vector<2x128xf32>
    %31 = tpu.matmul %30, %27, %cst_23 {dimension_numbers = #tpu.dot_dimension_numbers<[1], [0], [0], [1], [0, 0, 1, 1], [], []>} : vector<2x64xbf16>, vector<64x128xbf16>, vector<2x128xf32> -> vector<2x128xf32>
    %c0_24 = arith.constant 0 : index
    %c0_25 = arith.constant 0 : index
    %32 = vector.load %arg9[%c0_24, %c0_25] : memref<128x2xf32, #tpu.memory_space<vmem>>, vector<128x2xf32>
    %cst_26 = arith.constant dense<0.000000e+00> : vector<2x2xf32>
    %33 = tpu.matmul %29, %32, %cst_26 {dimension_numbers = #tpu.dot_dimension_numbers<[1], [0], [0], [1], [0, 0, 1, 1], [], []>} : vector<2x128xf32>, vector<128x2xf32>, vector<2x2xf32> -> vector<2x2xf32>
    %c0_27 = arith.constant 0 : index
    %c0_28 = arith.constant 0 : index
    %34 = vector.load %arg10[%c0_27, %c0_28] : memref<128x2xf32, #tpu.memory_space<vmem>>, vector<128x2xf32>
    %cst_29 = arith.constant dense<0.000000e+00> : vector<2x2xf32>
    %35 = tpu.matmul %31, %34, %cst_29 {dimension_numbers = #tpu.dot_dimension_numbers<[1], [0], [0], [1], [0, 0, 1, 1], [], []>} : vector<2x128xf32>, vector<128x2xf32>, vector<2x2xf32> -> vector<2x2xf32>
    %36 = arith.addf %33, %35 : vector<2x2xf32>
    %c0_30 = arith.constant 0 : index
    %c0_31 = arith.constant 0 : index
    %37 = vector.load %arg11[%c0_30, %c0_31] : memref<1x2xf32, #tpu.memory_space<vmem>>, vector<1x2xf32>
    %38 = vector.broadcast %37 : vector<1x2xf32> to vector<2x2xf32>
    %39 = arith.addf %36, %38 : vector<2x2xf32>
    %40 = vector.extract_strided_slice %39 {offsets = [0, 0], sizes = [2, 1], strides = [1, 1]} : vector<2x2xf32> to vector<2x1xf32>
    %41 = vector.extract_strided_slice %39 {offsets = [0, 1], sizes = [2, 1], strides = [1, 1]} : vector<2x2xf32> to vector<2x1xf32>
    %42 = arith.maximumf %40, %41 : vector<2x1xf32>
    %43 = arith.subf %40, %42 : vector<2x1xf32>
    %44 = math.exp %43 : vector<2x1xf32>
    %45 = arith.subf %41, %42 : vector<2x1xf32>
    %46 = math.exp %45 : vector<2x1xf32>
    %47 = arith.addf %44, %46 : vector<2x1xf32>
    %48 = math.log %47 : vector<2x1xf32>
    %49 = arith.addf %42, %48 : vector<2x1xf32>
    %50 = vector.broadcast %49 : vector<2x1xf32> to vector<2x2xf32>
    %51 = arith.subf %39, %50 : vector<2x2xf32>
    %c0_32 = arith.constant 0 : index
    %c0_33 = arith.constant 0 : index
    %c0_34 = arith.constant 0 : index
    %52 = vector.load %arg12[%c0_32, %c0_33, %c0_34] : memref<1x2x2xf32, #tpu.memory_space<vmem>>, vector<1x2x2xf32>
    %53 = vector.shape_cast %52 : vector<1x2x2xf32> to vector<2x2xf32>
    %54 = vector.shape_cast %51 : vector<2x2xf32> to vector<1x2x2xf32>
    tpu.vector_store %arg12[%c0_32, %c0_33, %c0_34], %54 {strides = array<i32>} : memref<1x2x2xf32, #tpu.memory_space<vmem>>, vector<1x2x2xf32>,
    return
  }
  func.func @transform_0(%arg0: i32) -> (i32, i32, i32) {
    %c0_i32 = arith.constant 0 : i32
    %c0_i32_0 = arith.constant 0 : i32
    %c0_i32_1 = arith.constant 0 : i32
    return %arg0, %c0_i32, %c0_i32_0 : i32, i32, i32
  }
  func.func @transform_1(%arg0: i32) -> (i32, i32, i32) {
    %c0_i32 = arith.constant 0 : i32
    %c0_i32_0 = arith.constant 0 : i32
    %c0_i32_1 = arith.constant 0 : i32
    return %arg0, %c0_i32, %c0_i32_0 : i32, i32, i32
  }
  func.func @transform_2(%arg0: i32) -> (i32, i32) {
    %c0_i32 = arith.constant 0 : i32
    %c0_i32_0 = arith.constant 0 : i32
    %c0_i32_1 = arith.constant 0 : i32
    return %c0_i32, %c0_i32_0 : i32, i32
  }
  func.func @transform_3(%arg0: i32) -> (i32, i32) {
    %c0_i32 = arith.constant 0 : i32
    %c0_i32_0 = arith.constant 0 : i32
    %c0_i32_1 = arith.constant 0 : i32
    return %c0_i32, %c0_i32_0 : i32, i32
  }
  func.func @transform_4(%arg0: i32) -> (i32, i32) {
    %c0_i32 = arith.constant 0 : i32
    %c0_i32_0 = arith.constant 0 : i32
    %c0_i32_1 = arith.constant 0 : i32
    return %c0_i32, %c0_i32_0 : i32, i32
  }
  func.func @transform_5(%arg0: i32) -> (i32, i32) {
    %c0_i32 = arith.constant 0 : i32
    %c0_i32_0 = arith.constant 0 : i32
    %c0_i32_1 = arith.constant 0 : i32
    return %c0_i32, %c0_i32_0 : i32, i32
  }
  func.func @transform_6(%arg0: i32) -> (i32, i32) {
    %c0_i32 = arith.constant 0 : i32
    %c0_i32_0 = arith.constant 0 : i32
    %c0_i32_1 = arith.constant 0 : i32
    return %c0_i32, %c0_i32_0 : i32, i32
  }
  func.func @transform_7(%arg0: i32) -> (i32, i32) {
    %c0_i32 = arith.constant 0 : i32
    %c0_i32_0 = arith.constant 0 : i32
    %c0_i32_1 = arith.constant 0 : i32
    return %c0_i32, %c0_i32_0 : i32, i32
  }
  func.func @transform_8(%arg0: i32) -> (i32, i32) {
    %c0_i32 = arith.constant 0 : i32
    %c0_i32_0 = arith.constant 0 : i32
    %c0_i32_1 = arith.constant 0 : i32
    return %c0_i32, %c0_i32_0 : i32, i32
  }
  func.func @transform_9(%arg0: i32) -> (i32, i32) {
    %c0_i32 = arith.constant 0 : i32
    %c0_i32_0 = arith.constant 0 : i32
    %c0_i32_1 = arith.constant 0 : i32
    return %c0_i32, %c0_i32_0 : i32, i32
  }
  func.func @transform_10(%arg0: i32) -> (i32, i32) {
    %c0_i32 = arith.constant 0 : i32
    %c0_i32_0 = arith.constant 0 : i32
    %c0_i32_1 = arith.constant 0 : i32
    return %c0_i32, %c0_i32_0 : i32, i32
  }
  func.func @transform_11(%arg0: i32) -> (i32, i32, i32) {
    %c0_i32 = arith.constant 0 : i32
    %c0_i32_0 = arith.constant 0 : i32
    %c0_i32_1 = arith.constant 0 : i32
    return %arg0, %c0_i32, %c0_i32_0 : i32, i32, i32
  }
}

</mosaic_0001>

<bundles_post_ra>
// kernel: net_forward.1
= control target key start
LH: loop header
LB: loop body
LE: loop exit
PB: predicated region body
PF: predicated region fallthrough
CT: control target
= control target key end

     0   :  { %vm100_vm0 = vcmask 523264   ;;  %s1553_s0 = inlined_call_operand.vmem [shape: bf16[1,64,64], index: 0, kind: input, shape index: {}]   ;;  %s1554_s1 = inlined_call_operand.vmem [shape: bf16[1,64,8], index: 1, kind: input, shape index: {}]   ;;  %s1555_s2 = inlined_call_operand.vmem [shape: bf16[8,128], index: 2, kind: input, shape index: {}]   ;;  %s1556_s3 = inlined_call_operand.vmem [shape: f32[1,64], index: 3, kind: input, shape index: {}]   ;;  %s1557_s4 = inlined_call_operand.vmem [shape: bf16[64,64], index: 4, kind: input, shape index: {}]   ;;  %s1558_s5 = inlined_call_operand.vmem [shape: f32[1,64], index: 5, kind: input, shape index: {}]   ;;  %s1559_s6 = inlined_call_operand.vmem [shape: bf16[2,64], index: 6, kind: input, shape index: {}]   ;;  %s1560_s7 = inlined_call_operand.vmem [shape: bf16[2,64], index: 7, kind: input, shape index: {}]   ;;  %s1561_s8 = inlined_call_operand.vmem [shape: f32[128,2], index: 8, kind: input, shape index: {}]   ;;  %s1562_s9 = inlined_call_operand.vmem [shape: f32[128,2], index: 9, kind: input, shape index: {}]   ;;  %s1563_s10 = inlined_call_operand.vmem [shape: f32[1,2], index: 10, kind: input, shape index: {}]   ;;  %s1564_s11 = inlined_call_operand.hbm [shape: f32[1,2,2], index: 11, kind: output, shape index: {}]  }
   0x1   :  { %v1187_v0 = vld [vmem:[%s1554_s1] sm:$0xff]   ;;  %v1188_v1 = vld [vmem:[%s1554_s1 + $0x8] sm:$0xff]   ;;  %v1189_v2 = vld [vmem:[%s1554_s1 + $0x10] sm:$0xff]  }
   0x2   :  { %976 = vmatprep.subr.bf16.mxu0 %v1187_v0  ;;  %v1191_v3 = vld [vmem:[%s1553_s0] sm:$0xff]   ;;  %v1190_v4 = vld [vmem:[%s1554_s1 + $0x18] sm:$0xff]  }
   0x3   :  { %977 = vmatpush3.bf16.msra.mxu0 %v1187_v0  ;;  %984 = vmatprep.mubr.msk.bf16.mxu0 %vm100_vm0, %v1191_v3 }
   0x4   :  { %978 = vmatprep.subr.bf16.mxu0 %v1188_v1 }
   0x7   :  { %979 = vmatpush3.bf16.msra.mxu0 %v1188_v1 }
   0x8   :  { %980 = vmatprep.subr.bf16.mxu0 %v1189_v2 }
   0x9   :  { %16 = vsyncpa [#allocation3], 0  ;;  %v1316_v5 = vld [vmem:[%s1553_s0 + $0x8] sm:$0xff]   ;;  %v1321_v6 = vld [vmem:[%s1553_s0 + $0x10] sm:$0xff]   ;;  %vm196_vm1 = vcmask 1043456   ;;  %vm183_vm2 = vcmask 64512  }
   0xa   :  { %v1330_v7 = vld [vmem:[%s1553_s0 + $0x18] sm:$0xff]   ;;  %v182_v8 = vld [vmem:[%s1555_s2] sm:$0xf]  ;;  %s1229_s15 = smov 64   ;;  %v1196_v29 = vld [vmem:[%s1557_s4 + $0x8] sm:$0xff]   ;;  %vm1231_vm3 = vmmov 0  }
   0xb   :  { %981 = vmatpush3.bf16.msra.mxu0 %v1189_v2  ;;  %1176 = vmatprep.subr.msk.bf16.mxu1 %vm196_vm1, %v182_v8  ;;  %v198_v9 = vsel %vm196_vm1, %v182_v8, 0  ;;  %v886_v22 = vld [vmem:[%s1556_s3] ss:$0 sm:$0xff]  ;;  %v1197_v38 = vld [vmem:[%s1557_s4 + $0x10] sm:$0xff]   ;;  %v1198_v54 = vld [vmem:[%s1557_s4 + $0x18] sm:$0xff]   ;;  %s1234_s16 = smov 1  }
   0xc   :  { %982 = vmatprep.subr.bf16.mxu0 %v1190_v4  ;;  %993 = vmatpush3.bf16.msra.mxu1 %v198_v9  ;;  %v1195_v28 = vld [vmem:[%s1557_s4] sm:$0xff]   ;;  %vm854_vm4 = vcmask 9216  }
   0xd   :  { %v899_v9 = vld [vmem:[%s1558_s5] ss:$0 sm:$0xff] }
   0xf   :  { %983 = vmatpush3.bf16.msra.mxu0 %v1190_v4 }
  0x10   :  { %1018 = vmatprep.subr.bf16.mxu0 %v1195_v28 }
  0x12   :  { %985 = vmatmul.mubr.msk.bf16.vlgmr.msra.gmra.mrb[0].mxu0 %vm100_vm0, %v1316_v5 }
  0x13   :  { %988 = vmatprep.mubr.msk.bf16.mxu0 %vm100_vm0, %v1321_v6  ;;  %1019 = vmatpush3.bf16.msra.mxu0 %v1195_v28 }
  0x14   :  { %1020 = vmatprep.subr.bf16.mxu0 %v1196_v29 }
  0x17   :  { %1021 = vmatpush3.bf16.msra.mxu0 %v1196_v29 }
  0x18   :  { %1022 = vmatprep.subr.bf16.mxu0 %v1197_v38 }
  0x1a   :  { %989 = vmatmul.mubr.msk.bf16.gmra.mrb[4].mxu0 %vm100_vm0, %v1330_v7 }
  0x1b   :  { %1023 = vmatpush3.bf16.msra.mxu0 %v1197_v38 }
  0x1c   :  { %1024 = vmatprep.subr.bf16.mxu0 %v1198_v54 }
  0x1f   :  { %1025 = vmatpush3.bf16.msra.mxu0 %v1198_v54 }
  0xe5   :  { %v986_v10 = vpop.f32.mrb[0].mxu0 }
  0xe6   :  { %v147_v11 = vpop.f32.mrb[1].mxu0 }
  0xe7   :  { %v987_v12 = vpop.f32.mrb[2].mxu0 }
  0xe8   :  { %v179_v13 = vpack.c.bf16 %v987_v12, %v986_v10  ;;  %v150_v14 = vpop.f32.mrb[3].mxu0 }
  0xe9   :  { %v178_v15 = vpack.c.bf16 %v150_v14, %v147_v11 }
  0xeb   :  { %994 = vmatprep.mubr.msk.bf16.mxu1 %vm183_vm2, %v178_v15 }
  0xec   :  { %995 = vmatmul.mubr.msk.bf16.vlgmr.msra.gmra.mrb[0].mxu1 %vm183_vm2, %v179_v13 }
  0xed   :  { %v990_v16 = vpop.f32.mrb[4].mxu0 }
  0xee   :  { %v163_v17 = vpop.f32.mrb[5].mxu0 }
  0xef   :  { %v991_v18 = vpop.f32.mrb[6].mxu0 }
  0xf0   :  { %v181_v19 = vpack.c.bf16 %v991_v18, %v990_v16  ;;  %v166_v20 = vpop.f32.mrb[7].mxu0 }
  0xf1   :  { %v180_v21 = vpack.c.bf16 %v166_v20, %v163_v17 }
  0xf3   :  { %998 = vmatprep.mubr.msk.bf16.mxu1 %vm183_vm2, %v180_v21 }
  0xf4   :  { %999 = vmatmul.mubr.msk.bf16.gmra.mrb[4].mxu1 %vm183_vm2, %v181_v19 }
  0xf5   :  { %1010 = vmatprep.mubr.msk.bf16.mxu1 %vm100_vm0, %v1191_v3 }
 0x1bf   :  { %v996_v23 = vpop.f32.mrb[0].mxu1 }
 0x1c0   :  { %v274_v24 = vadd.f32 %v996_v23, %v886_v22  ;;  %405 = vrot.lane.b32.xlu1 %v996_v23, %s1229_s15  ;;  %v234_v25 = vpop.f32.mrb[1].mxu1 }
 0x1c1   :  { %v272_v26 = vadd.f32 %v886_v22, %v234_v25  ;;  %401 = vrot.lane.b32.xlu0 %v234_v25, %s1229_s15  ;;  %v997_v27 = vpop.f32.mrb[2].mxu1 }
 0x1c2   :  { %v275_v30 = vadd.f32 %v997_v27, %v886_v22  ;;  %v237_v31 = vpop.f32.mrb[3].mxu1  ;;  %v282_v33 = vmax.f32 %v274_v24, 0.0 }
 0x1c3   :  { %v273_v32 = vadd.f32 %v886_v22, %v237_v31  ;;  %v280_v35 = vmax.f32 %v272_v26, 0.0 }
 0x1c4   :  { %v283_v34 = vmax.f32 %v275_v30, 0.0  ;;  %407 = vrot.lane.b32.xlu1 %v997_v27, %s1229_s15 }
 0x1c5   :  { %v281_v36 = vmax.f32 %v273_v32, 0.0  ;;  %403 = vrot.lane.b32.xlu0 %v237_v31, %s1229_s15 }
 0x1c6   :  { %v1351_v37 = vpack.c.bf16 %v283_v34, %v282_v33 }
 0x1c7   :  { %v1000_v39 = vpop.f32.mrb[4].mxu1  ;;  %v1356_v40 = vpack.c.bf16 %v281_v36, %v280_v35 }
 0x1c8   :  { %v278_v41 = vadd.f32 %v1000_v39, %v886_v22  ;;  %v250_v42 = vpop.f32.mrb[5].mxu1 }
 0x1c9   :  { %v276_v43 = vadd.f32 %v886_v22, %v250_v42  ;;  %1002 = vmatprep.subr.bf16.mxu1 %v1356_v40  ;;  %409 = vrot.lane.b32.xlu0 %v250_v42, %s1229_s15  ;;  %v1001_v44 = vpop.f32.mrb[6].mxu1 }
 0x1ca   :  { %v279_v45 = vadd.f32 %v1001_v44, %v886_v22  ;;  %v253_v46 = vpop.f32.mrb[7].mxu1  ;;  %1003 = vmatpush3.bf16.msra.mxu1 %v1356_v40  ;;  %v286_v48 = vmax.f32 %v278_v41, 0.0 }
 0x1cb   :  { %v277_v47 = vadd.f32 %v886_v22, %v253_v46  ;;  %1004 = vmatprep.subr.bf16.mxu1 %v1351_v37  ;;  %411 = vrot.lane.b32.xlu1 %v253_v46, %s1229_s15  ;;  %v284_v50 = vmax.f32 %v276_v43, 0.0 }
 0x1cc   :  { %v287_v49 = vmax.f32 %v279_v45, 0.0 }
 0x1cd   :  { %v285_v51 = vmax.f32 %v277_v47, 0.0  ;;  %413 = vrot.lane.b32.xlu0 %v1000_v39, %s1229_s15 }
 0x1ce   :  { %1005 = vmatpush3.bf16.msra.mxu1 %v1351_v37  ;;  %v1365_v52 = vpack.c.bf16 %v287_v49, %v286_v48 }
 0x1cf   :  { %415 = vrot.lane.b32.xlu1 %v1001_v44, %s1229_s15  ;;  %v1368_v53 = vpack.c.bf16 %v285_v51, %v284_v50 }
 0x1d1   :  { %1006 = vmatprep.subr.bf16.mxu1 %v1368_v53 }
 0x1d2   :  { %1007 = vmatpush3.bf16.msra.mxu1 %v1368_v53 }
 0x1d3   :  { %1008 = vmatprep.subr.bf16.mxu1 %v1365_v52 }
 0x1d6   :  { %1009 = vmatpush3.bf16.msra.mxu1 %v1365_v52 }
 0x1d9   :  { %1011 = vmatmul.mubr.msk.bf16.vlgmr.msra.gmra.mrb[8].mxu1 %vm100_vm0, %v1316_v5 }
 0x1da   :  { %1014 = vmatprep.mubr.msk.bf16.mxu1 %vm100_vm0, %v1321_v6  ;;  %v1230_v6 = vmov 0.0  }
 0x1db   :  { %1034 = vmatprep.subr.bf16.mxu1 %v1230_v6  ;;  %1046 = vmatprep.subr.bf16.mxu0 %v1230_v6 }
 0x1e1   :  { %1015 = vmatmul.mubr.msk.bf16.gmra.mrb[12].mxu1 %vm100_vm0, %v1330_v7 }
 0x1e2   :  { %1042 = vmatprep.mubr.msk.bf16.mxu1 %vm1231_vm3, %v1230_v6 }
 0x232   :  { %v406_v4 = vpop.permute.xlu1 %405 }
 0x233   :  { %v402_v3 = vpop.permute.xlu0 %401 }
 0x236   :  { %v408_v7 = vpop.permute.xlu1 %407 }
 0x237   :  { %v404_v5 = vpop.permute.xlu0 %403 }
 0x23b   :  { %v410_v12 = vpop.permute.xlu0 %409 }
 0x23d   :  { %v412_v18 = vpop.permute.xlu1 %411 }
 0x23f   :  { %v414_v25 = vpop.permute.xlu0 %413 }
 0x241   :  { %v416_v32 = vpop.permute.xlu1 %415 }
 0x2ac   :  { %v1012_v55 = vpop.f32.mrb[8].mxu1 }
 0x2ad   :  { %v326_v56 = vpop.f32.mrb[9].mxu1 }
 0x2ae   :  { %v1013_v57 = vpop.f32.mrb[10].mxu1 }
 0x2af   :  { %v358_v58 = vpack.c.bf16 %v1013_v57, %v1012_v55  ;;  %v329_v59 = vpop.f32.mrb[11].mxu1 }
 0x2b0   :  { %v357_v60 = vpack.c.bf16 %v329_v59, %v326_v56  ;;  %v661_v59 = vld [vmem:[%s1562_s9] sm:$0xff] }
 0x2b2   :  { %1026 = vmatprep.mubr.msk.bf16.mxu0 %vm100_vm0, %v357_v60  ;;  %v645_v60 = vld [vmem:[%s1561_s8] sm:$0xff] }
 0x2b3   :  { %1027 = vmatmul.mubr.msk.bf16.vlgmr.msra.gmra.mrb[8].mxu0 %vm100_vm0, %v358_v58 }
 0x2b4   :  { %v1016_v61 = vpop.f32.mrb[12].mxu1 }
 0x2b5   :  { %v342_v62 = vpop.f32.mrb[13].mxu1 }
 0x2b6   :  { %v1017_v63 = vpop.f32.mrb[14].mxu1 }
 0x2b7   :  { %v360_v0 = vpack.c.bf16 %v1017_v63, %v1016_v61  ;;  %v345_v1 = vpop.f32.mrb[15].mxu1  ;;  %v601_v63 = vld [vmem:[%s1560_s7] sm:$0x1] }
 0x2b8   :  { %v359_v2 = vpack.c.bf16 %v345_v1, %v342_v62  ;;  %v557_v62 = vld [vmem:[%s1559_s6] sm:$0x1] }
 0x2ba   :  { %1030 = vmatprep.mubr.msk.bf16.mxu0 %vm100_vm0, %v359_v2  ;;  %v663_v2 = vld [vmem:[%s1562_s9 + $0x10] sm:$0xff] }
 0x2bb   :  { %1031 = vmatmul.mubr.msk.bf16.gmra.mrb[12].mxu0 %vm100_vm0, %v360_v0 }
 0x2bc   :  { %1054 = vmatprep.mubr.msk.bf16.mxu0 %vm1231_vm3, %v1230_v6 }
 0x386   :  { %v1028_v8 = vpop.f32.mrb[8].mxu0 }
 0x387   :  { %v480_v10 = vadd.f32 %v1028_v8, %v406_v4  ;;  %v471_v11 = vpop.f32.mrb[9].mxu0  ;;  %v647_v4 = vld [vmem:[%s1561_s8 + $0x10] sm:$0xff] }
 0x388   :  { %v472_v13 = vadd.f32 %v471_v11, %v402_v3  ;;  %v1029_v14 = vpop.f32.mrb[10].mxu0  ;;  %v1232_v3 = vmov 0.0|0.0   ;;  %v649_v11 = vld [vmem:[%s1561_s8 + $0x20] sm:$0xff] }
 0x389   :  { %v511_v15 = vadd.f32 %v899_v9, %v480_v10  ;;  %v483_v16 = vadd.f32 %v1029_v14, %v408_v7  ;;  %v474_v17 = vpop.f32.mrb[11].mxu0  ;;  %v666_v10 = vld [vmem:[%s1562_s9 + $0x28] sm:$0xff] }
 0x38a   :  { %v509_v19 = vadd.f32 %v899_v9, %v472_v13  ;;  %v475_v20 = vadd.f32 %v474_v17, %v404_v5  ;;  %v648_v5 = vld [vmem:[%s1561_s8 + $0x18] sm:$0xff] }
 0x38b   :  { %v512_v21 = vadd.f32 %v899_v9, %v483_v16  ;;  %v519_v23 = vmax.f32 %v511_v15, 0.0  ;;  %v1156_v8 = vpack.c.bf16 %v648_v5, %v647_v4  ;;  %v667_v15 = vld [vmem:[%s1562_s9 + $0x30] sm:$0xff]  ;;  %v668_v16 = vld [vmem:[%s1562_s9 + $0x38] sm:$0xff] }
 0x38c   :  { %v510_v22 = vadd.f32 %v899_v9, %v475_v20  ;;  %v517_v26 = vmax.f32 %v509_v19, 0.0  ;;  %v652_v17 = vld [vmem:[%s1561_s8 + $0x38] sm:$0xff]  ;;  %v669_v20 = vld [vmem:[%s1562_s9 + $0x40] sm:$0xff] }
 0x38d   :  { %v520_v24 = vmax.f32 %v512_v21, 0.0  ;;  %v670_v21 = vld [vmem:[%s1562_s9 + $0x48] sm:$0xff] }
 0x38e   :  { %v518_v27 = vmax.f32 %v510_v22, 0.0  ;;  %v1032_v28 = vpop.f32.mrb[12].mxu0  ;;  %v653_v22 = vld [vmem:[%s1561_s8 + $0x40] sm:$0xff] }
 0x38f   :  { %v496_v29 = vadd.f32 %v1032_v28, %v414_v25  ;;  %v487_v30 = vpop.f32.mrb[13].mxu0  ;;  %v526_v31 = vpack.c.bf16 %v520_v24, %v519_v23  ;;  %v654_v23 = vld [vmem:[%s1561_s8 + $0x48] sm:$0xff]  ;;  %v1141_v24 = vpack.c.bf16 %v670_v21, %v669_v20  ;;  %v655_v28 = vld [vmem:[%s1561_s8 + $0x50] sm:$0xff] }
 0x390   :  { %v488_v33 = vadd.f32 %v487_v30, %v410_v12  ;;  %v1033_v34 = vpop.f32.mrb[14].mxu0  ;;  %v525_v35 = vpack.c.bf16 %v518_v27, %v517_v26  ;;  %v650_v12 = vld [vmem:[%s1561_s8 + $0x28] sm:$0xff]  ;;  %v1165_v25 = vpack.c.bf16 %v654_v23, %v653_v22  ;;  %v671_v26 = vld [vmem:[%s1562_s9 + $0x50] sm:$0xff]  ;;  %v672_v27 = vld [vmem:[%s1562_s9 + $0x58] sm:$0xff] }
 0x391   :  { %v515_v36 = vadd.f32 %v899_v9, %v496_v29  ;;  %v499_v38 = vadd.f32 %v1033_v34, %v416_v32  ;;  %535 = vrot.lane.b32.xlu1 %v526_v31, %s1229_s15  ;;  %v490_v39 = vpop.f32.mrb[15].mxu0  ;;  %v1159_v14 = vpack.c.bf16 %v650_v12, %v649_v11  ;;  %v656_v29 = vld [vmem:[%s1561_s8 + $0x58] sm:$0xff]  ;;  %v1144_v30 = vpack.c.bf16 %v672_v27, %v671_v26  ;;  %v673_v32 = vld [vmem:[%s1562_s9 + $0x60] sm:$0xff] }
 0x392   :  { %v513_v41 = vadd.f32 %v899_v9, %v488_v33  ;;  %v491_v42 = vadd.f32 %v490_v39, %v412_v18  ;;  %533 = vrot.lane.b32.xlu0 %v525_v35, %s1229_s15  ;;  %v1138_v18 = vpack.c.bf16 %v668_v16, %v667_v15  ;;  %v1168_v31 = vpack.c.bf16 %v656_v29, %v655_v28  ;;  %v674_v33 = vld [vmem:[%s1562_s9 + $0x68] sm:$0xff]  ;;  %v657_v34 = vld [vmem:[%s1561_s8 + $0x60] sm:$0xff]  ;;  %v675_v39 = vld [vmem:[%s1562_s9 + $0x70] sm:$0xff] }
 0x393   :  { %v516_v43 = vadd.f32 %v899_v9, %v499_v38  ;;  %v523_v45 = vmax.f32 %v515_v36, 0.0  ;;  %v658_v35 = vld [vmem:[%s1561_s8 + $0x68] sm:$0xff]  ;;  %v1147_v36 = vpack.c.bf16 %v674_v33, %v673_v32 }
 0x394   :  { %v514_v44 = vadd.f32 %v899_v9, %v491_v42  ;;  %v521_v47 = vmax.f32 %v513_v41, 0.0  ;;  %v665_v9 = vld [vmem:[%s1562_s9 + $0x20] sm:$0xff]  ;;  %v1171_v38 = vpack.c.bf16 %v658_v35, %v657_v34  ;;  %v676_v41 = vld [vmem:[%s1562_s9 + $0x78] sm:$0xff]  ;;  %v659_v42 = vld [vmem:[%s1561_s8 + $0x70] sm:$0xff] }
 0x395   :  { %v524_v46 = vmax.f32 %v516_v43, 0.0  ;;  %v1135_v13 = vpack.c.bf16 %v666_v10, %v665_v9  ;;  %v660_v43 = vld [vmem:[%s1561_s8 + $0x78] sm:$0xff] }
 0x396   :  { %v522_v48 = vmax.f32 %v514_v44, 0.0  ;;  %v1150_v44 = vpack.c.bf16 %v676_v41, %v675_v39 }
 0x397   :  { %v528_v49 = vpack.c.bf16 %v524_v46, %v523_v45  ;;  %v1174_v45 = vpack.c.bf16 %v660_v43, %v659_v42 }
 0x398   :  { %v527_v50 = vpack.c.bf16 %v522_v48, %v521_v47 }
 0x399   :  { %539 = vrot.lane.b32.xlu1 %v528_v49, %s1229_s15 }
 0x39a   :  { %537 = vrot.lane.b32.xlu0 %v527_v50, %s1229_s15  ;;  %s1233_s15 = smov 127  }
 0x403   :  { %v536_v55 = vpop.permute.xlu1 %535 }
 0x404   :  { %v534_v51 = vpop.permute.xlu0 %533  ;;  %v547_v56 = vsel %vm100_vm0, %v1351_v37, %v536_v55  ;;  %v662_v37 = vld [vmem:[%s1562_s9 + $0x8] sm:$0xff] }
 0x405   :  { %v543_v54 = vsel %vm100_vm0, %v1356_v40, %v534_v51  ;;  %v1129_v0 = vpack.c.bf16 %v662_v37, %v661_v59 }
 0x406   :  { %1035 = vmatpush3.bf16.msra.mxu1 %v543_v54  ;;  %1047 = vmatpush3.bf16.msra.mxu0 %v543_v54 }
 0x407   :  { %1036 = vmatprep.subr.bf16.mxu1 %v1230_v6  ;;  %1048 = vmatprep.subr.bf16.mxu0 %v1230_v6 }
 0x40a   :  { %1037 = vmatpush3.bf16.msra.mxu1 %v547_v56  ;;  %1049 = vmatpush3.bf16.msra.mxu0 %v547_v56 }
 0x40b   :  { %1038 = vmatprep.subr.bf16.mxu1 %v1230_v6  ;;  %1050 = vmatprep.subr.bf16.mxu0 %v1230_v6  ;;  %v540_v58 = vpop.permute.xlu1 %539 }
 0x40c   :  { %v538_v57 = vpop.permute.xlu0 %537  ;;  %v555_v61 = vsel %vm100_vm0, %v1365_v52, %v540_v58  ;;  %v664_v52 = vld [vmem:[%s1562_s9 + $0x18] sm:$0xff] }
 0x40d   :  { %v551_v40 = vsel %vm100_vm0, %v1368_v53, %v538_v57  ;;  %v646_v53 = vld [vmem:[%s1561_s8 + $0x8] sm:$0xff]  ;;  %v1132_v7 = vpack.c.bf16 %v664_v52, %v663_v2  ;;  %v1235_v2 = vmov 0  }
 0x40e   :  { %1039 = vmatpush3.bf16.msra.mxu1 %v551_v40  ;;  %1051 = vmatpush3.bf16.msra.mxu0 %v551_v40  ;;  %v1153_v1 = vpack.c.bf16 %v646_v53, %v645_v60  ;;  %v902_v40 = vld [vmem:[%s1563_s10] ss:$0 sm:$0xff]  ;;  %s1236_s10 = smov [#allocation2]  }
 0x40f   :  { %1040 = vmatprep.subr.bf16.mxu1 %v1230_v6  ;;  %1052 = vmatprep.subr.bf16.mxu0 %v1230_v6  ;;  %s862_s6 = sshll.u32 %s1236_s10, 4  ;;  %s863_s6 = int_to_ptr.vmem [resolvable:$true] %s862_s6 }
 0x410   :  { %1185 = vset.pattern.permute.xlu1 %v1235_v2  ;;  %1186 = vset.pattern.permute.xlu0 %v1235_v2  ;;  %s1205_s17 = scalar_lea.vmem %s863_s6, 32  ;;  %p1210_p1 = scmp.lt.s32.totalorder %s863_s6, %s863_s6 }
 0x411   :  { %p1206_p0 = scmp.ne.s32.totalorder %s863_s6, %s1205_s17  ;;  %p1211_p2 = scmp.lt.s32.totalorder %s1205_s17, %s1205_s17 }
 0x412   :  { %1041 = vmatpush3.bf16.msra.mxu1 %v555_v61  ;;  %1053 = vmatpush3.bf16.msra.mxu0 %v555_v61 }
 0x413   :  { %1128 = vmatprep.subr.bf16.mxu1 %v1232_v3  ;;  %1152 = vmatprep.subr.bf16.mxu0 %v1232_v3  ;;  %p1212_p3 = por %p1211_p2, %p1210_p1 }
 0x415   :  { %1043 = vmatmul.mubr.msk.bf16.vlgmr.msra.gmra.mrb[16].mxu1 %vm100_vm0, %v557_v62  ;;  %1055 = vmatmul.mubr.msk.bf16.vlgmr.msra.gmra.mrb[16].mxu0 %vm100_vm0, %v601_v63  ;;  %p1213_p4 = pnand %p1212_p3, %p1206_p0 }
 0x416   :  { %1130 = vmatpush3.bf16.msra.mxu1 %v1129_v0  ;;  %1154 = vmatpush3.bf16.msra.mxu0 %v1153_v1 }
 0x417   :  { %1131 = vmatprep.subr.bf16.mxu1 %v1232_v3  ;;  %1155 = vmatprep.subr.bf16.mxu0 %v1232_v3 }
 0x418   :  { %1090 = vmatprep.mubr.msk.f32.mxu1 %vm1231_vm3, %v1230_v6  ;;  %1125 = vmatprep.mubr.msk.f32.mxu0 %vm1231_vm3, %v1230_v6  ;;  %v651_v6 = vld [vmem:[%s1561_s8 + $0x30] sm:$0xff] }
 0x419   :  { %v1162_v19 = vpack.c.bf16 %v652_v17, %v651_v6 }
 0x41a   :  { %1133 = vmatpush3.bf16.msra.mxu1 %v1132_v7  ;;  %1157 = vmatpush3.bf16.msra.mxu0 %v1156_v8 }
 0x41b   :  { %1134 = vmatprep.subr.bf16.mxu1 %v1232_v3  ;;  %1158 = vmatprep.subr.bf16.mxu0 %v1232_v3 }
 0x41e   :  { %1136 = vmatpush3.bf16.msra.mxu1 %v1135_v13  ;;  %1160 = vmatpush3.bf16.msra.mxu0 %v1159_v14 }
 0x41f   :  { %1137 = vmatprep.subr.bf16.mxu1 %v1232_v3  ;;  %1161 = vmatprep.subr.bf16.mxu0 %v1232_v3 }
 0x422   :  { %1139 = vmatpush3.bf16.msra.mxu1 %v1138_v18  ;;  %1163 = vmatpush3.bf16.msra.mxu0 %v1162_v19 }
 0x423   :  { %1140 = vmatprep.subr.bf16.mxu1 %v1232_v3  ;;  %1164 = vmatprep.subr.bf16.mxu0 %v1232_v3 }
 0x426   :  { %1142 = vmatpush3.bf16.msra.mxu1 %v1141_v24  ;;  %1166 = vmatpush3.bf16.msra.mxu0 %v1165_v25 }
 0x427   :  { %1143 = vmatprep.subr.bf16.mxu1 %v1232_v3  ;;  %1167 = vmatprep.subr.bf16.mxu0 %v1232_v3 }
 0x42a   :  { %1145 = vmatpush3.bf16.msra.mxu1 %v1144_v30  ;;  %1169 = vmatpush3.bf16.msra.mxu0 %v1168_v31 }
 0x42b   :  { %1146 = vmatprep.subr.bf16.mxu1 %v1232_v3  ;;  %1170 = vmatprep.subr.bf16.mxu0 %v1232_v3 }
 0x42e   :  { %1148 = vmatpush3.bf16.msra.mxu1 %v1147_v36  ;;  %1172 = vmatpush3.bf16.msra.mxu0 %v1171_v38 }
 0x42f   :  { %1149 = vmatprep.subr.bf16.mxu1 %v1232_v3  ;;  %1173 = vmatprep.subr.bf16.mxu0 %v1232_v3 }
 0x432   :  { %1151 = vmatpush3.bf16.msra.mxu1 %v1150_v44  ;;  %1175 = vmatpush3.bf16.msra.mxu0 %v1174_v45 }
 0x4e8   :  { %v595_v46 = vpop.f32.mrb[16].mxu1  ;;  %v639_v47 = vpop.f32.mrb[16].mxu0 }
 0x4e9   :  { %v1044_v48 = vpop.f32.mrb[17].mxu1  ;;  %v1056_v49 = vpop.f32.mrb[17].mxu0  ;;  %1091 = vmatmul.mubr.f32.vlgmr.msra.gmra.mrb[20].mxu1 %v639_v47  ;;  %1126 = vmatmul.mubr.f32.vlgmr.msra.gmra.mrb[20].mxu0 %v595_v46 }
 0x4ea   :  { %v598_v50 = vpop.f32.mrb[18].mxu1  ;;  %v642_v51 = vpop.f32.mrb[18].mxu0 }
 0x4eb   :  { %v1045_v54 = vpop.f32.mrb[19].mxu1  ;;  %v1057_v55 = vpop.f32.mrb[19].mxu0 }
 0x5bc   :  { %v743_v56 = vpop.f32.mrb[20].mxu1  ;;  %v813_v57 = vpop.f32.mrb[20].mxu0 }
 0x5bd   :  { %v814_v58 = vadd.f32 %v813_v57, %v743_v56  ;;  %v1092_v59 = vpop.f32.mrb[21].mxu1  ;;  %v1127_v37 = vpop.f32.mrb[21].mxu0 }
 0x5bf   :  { %v824_v60 = vadd.f32 %v902_v40, %v814_v58 }
 0x5c1   :  { %826 = vrot.lane.b32.xlu0 %v824_v60, %s1233_s15 }
 0x633   :  { %v827_v53 = vpop.permute.xlu0 %826 }
 0x634   :  { %v829_v61 = vmax.f32 %v824_v60, %v827_v53 }
 0x636   :  { %834 = vrot.lane.b32.xlu1 %v829_v61, %s1234_s16  ;;  %v830_v3 = vsub.f32 %v824_v60, %v829_v61 }
 0x638   :  { %v831_v52 = vmul.f32 1.442695, %v830_v3 }
 0x6a8   :  { %v835_v62 = vpop.permute.xlu1 %834 }
 0x6a9   :  { %v837_v63 = vsub.f32 %v824_v60, %v835_v62 }
 0x6ab   :  { %v838_v0 = vmul.f32 1.442695, %v837_v63 }
 0x6ad   :  { %1199 = vpow2.f32 %v838_v0 }
 0x6ae   :  { %1201 = vpow2.f32 %v831_v52 }
 0x6b7   :  { %v1200_v1 = vpop.eup %1199 }
 0x6b8   :  { %841 = vrot.lane.b32.xlu0 %v1200_v1, %s1233_s15  ;;  %v1202_v4 = vpop.eup %1201 }
 0x72a   :  { %v842_v5 = vpop.permute.xlu0 %841 }
 0x72b   :  { %v844_v7 = vadd.f32 %v1202_v4, %v842_v5 }
 0x72d   :  { %1203 = vlog2.f32 %v844_v7 }
 0x737   :  { %v1204_v8 = vpop.eup %1203 }
 0x738   :  { %v846_v9 = vmul.f32 0.6931472, %v1204_v8 }
 0x73a   :  { %v847_v10 = vadd.f32 %v846_v9, %v829_v61 }
 0x73c   :  { %850 = vperm.xlu1 %1185, %v847_v10  }
 0x7bb   :  { %v851_v11 = vpop.permute.xlu1 %850 }
 0x7bc   :  { %v853_v12 = vsub.f32 %v824_v60, %v851_v11 }
 0x7be   :  { %855 = vst.msk [vmem:[#allocation2] sm:$0x3] %vm854_vm4, %v853_v12 }
 0x7bf   :  { %1216 = shalt.err (!%p1213_p4)
}
 0x7c0   :  { %s1217_s19 = scalar_lea.hbm %s1564_s11, 32 }
 0x7c1   :  { %p1218_p5 = scmp.ne.s32.totalorder %s1564_s11, %s1217_s19  ;;  %p1221_p6 = scmp.lt.u32.totalorder %s1217_s19, %s1564_s11 }
 0x7c3   :  { %p1223_p7 = pnand %p1221_p6, %p1218_p5 }
 0x7c5   :  { %1226 = shalt.err (!%p1223_p7)
}
 0x7c6   :  { %865 = dma.vmem_to_hbm [thread:$0]  %s863_s6, 32, %s1564_s11, [#allocation3]  }
 0x7c7   :  { %1227 = dma.done.wait [#allocation3], 32  }
 0x7c8   :  { %1228 = vsyncadd [#allocation3], 4294967264 }
 0x7c9   :  { %869 = vsyncpa [#allocation3], 1 }

</bundles_post_ra>
